<compile_context>
chip_gen: v7x
topology: tpu7x:2x2x1
jax: 0.10.0
libtpu: 0.0.40
codegen_flags: <defaults>
</compile_context>

<pallas_src>
import functools

import numpy as np
import jax
import jax.numpy as jnp
from jax import lax
from jax.experimental import pallas as pl
from jax.experimental.pallas import tpu as pltpu


def _round_up(n, m):
    return ((n + m - 1) // m) * m


def _cdiv(a, b):
    return -(-a // b)


def _mlp_kernel(*refs, depth: int, unroll: bool):
    """Whole MLP (in->tanh, depth x [hidden->tanh], out) on one batch tile."""
    if depth > 0:
        (x_ref, w_in_ref, b_in_ref, w_blk_ref, b_blk_ref,
         w_out_ref, b_out_ref, o_ref) = refs
    else:
        (x_ref, w_in_ref, b_in_ref, w_out_ref, b_out_ref, o_ref) = refs

    mxu_dtype = w_in_ref.dtype  # bf16 feeds the MXU; accumulate in f32.

    # Input layer: (tm, Din_p) @ (Din_p, H_p); bias add + tanh in f32.
    h = jnp.dot(x_ref[...], w_in_ref[...], preferred_element_type=jnp.float32)
    h = jnp.tanh(h + b_in_ref[...])

    # Hidden blocks.  Activation is carried as a value (no per-layer VMEM
    # scratch vst+vld); weights stay VMEM-resident for the whole call.
    if depth > 0:
        if unroll:
            for l in range(depth):
                z = jnp.dot(h.astype(mxu_dtype), w_blk_ref[l],
                            preferred_element_type=jnp.float32)
                h = jnp.tanh(z + b_blk_ref[l])
        else:
            # Large depth: bound code size / live ranges with a fori_loop and a
            # dynamic first-axis weight index.
            def body(l, h):
                z = jnp.dot(h.astype(mxu_dtype), w_blk_ref[l],
                            preferred_element_type=jnp.float32)
                return jnp.tanh(z + b_blk_ref[l])
            h = lax.fori_loop(0, depth, body, h)

    # Output layer (no activation), lane-dense store.
    y = jnp.dot(h.astype(mxu_dtype), w_out_ref[...],
                preferred_element_type=jnp.float32)
    o_ref[...] = (y + b_out_ref[...]).astype(o_ref.dtype)


def mlp_forward(params, x, *, tm_max=256, mxu_dtype=jnp.bfloat16,
                unroll_max_depth=8):
    """Full MLP forward as a single fused pallas_call."""
    batch, input_dim = x.shape
    w_in, b_in = params["input"]
    w_out, b_out = params["output"]
    hidden_dim = w_in.shape[1]
    output_dim = w_out.shape[1]
    depth = len(params["blocks"])
    out_dtype = x.dtype

    # Lane-dense (128) feature padding.  (Dim-selection note: on v6e/v7x,
    # model dims near 256 multiples fill the 256x256 MXU better; we keep the
    # pad granularity at 128 so we never blindly double FLOPs.)
    din_p = _round_up(input_dim, 128)
    h_p = _round_up(hidden_dim, 128)
    dout_p = _round_up(output_dim, 128)

    # Batch tiling: nearly-full last tile (no padding waste), and >=2 grid
    # steps for large batches so the "parallel" axis spans both TensorCores on
    # v7x (neutral on single-TC v5e/v6e).
    b8 = _round_up(batch, 8)
    n_steps = _cdiv(b8, tm_max)
    if b8 >= 256:
        n_steps = max(n_steps, 2)
    tm = _round_up(_cdiv(b8, n_steps), 8)
    n_steps = _cdiv(b8, tm)
    b_p = tm * n_steps
    grid = (n_steps,)

    def pad2(a, rows, cols):
        return jnp.pad(a, ((0, rows - a.shape[0]), (0, cols - a.shape[1])))

    # Weights / activations feed the MXU in bf16; biases stay f32 (the bias
    # add + tanh run in f32).  Zero padding is exact: padded weight cols + zero
    # bias -> tanh(0)=0 activations that multiply zero weight rows downstream.
    x_p = pad2(x, b_p, din_p).astype(mxu_dtype)
    w_in_p = pad2(w_in, din_p, h_p).astype(mxu_dtype)
    b_in_p = jnp.pad(b_in, (0, h_p - hidden_dim)).reshape(1, h_p).astype(jnp.float32)
    w_out_p = pad2(w_out, h_p, dout_p).astype(mxu_dtype)
    b_out_p = jnp.pad(b_out, (0, dout_p - output_dim)).reshape(1, dout_p).astype(jnp.float32)

    single = pl.Buffered(1)  # constant-index blocks: single-buffer in VMEM

    args = [x_p, w_in_p, b_in_p]
    in_specs = [
        pl.BlockSpec((tm, din_p), lambda i: (i, 0)),               # batch-tiled
        pl.BlockSpec((din_p, h_p), lambda i: (0, 0), pipeline_mode=single),
        pl.BlockSpec((1, h_p), lambda i: (0, 0), pipeline_mode=single),
    ]
    if depth > 0:
        w_blk_p = jnp.stack(
            [pad2(w, h_p, h_p) for w, _ in params["blocks"]]).astype(mxu_dtype)
        b_blk_p = jnp.stack(
            [jnp.pad(b, (0, h_p - hidden_dim)).reshape(1, h_p)
             for _, b in params["blocks"]]).astype(jnp.float32)
        args += [w_blk_p, b_blk_p]
        in_specs += [
            pl.BlockSpec((depth, h_p, h_p), lambda i: (0, 0, 0),
                         pipeline_mode=single),
            pl.BlockSpec((depth, 1, h_p), lambda i: (0, 0, 0),
                         pipeline_mode=single),
        ]
    args += [w_out_p, b_out_p]
    in_specs += [
        pl.BlockSpec((h_p, dout_p), lambda i: (0, 0), pipeline_mode=single),
        pl.BlockSpec((1, dout_p), lambda i: (0, 0), pipeline_mode=single),
    ]

    # Explicit scoped-VMEM budget: single-buffered weights + f32 biases +
    # double-buffered x/out tiles, with headroom; capped at 48 MiB (safe under
    # v7x's 64 MiB physical VMEM, trivially under v5e/v6e's 128 MiB).
    mxu_bytes = np.dtype(mxu_dtype).itemsize
    out_bytes = np.dtype(out_dtype).itemsize
    w_bytes = (din_p * h_p + depth * h_p * h_p + h_p * dout_p) * mxu_bytes
    bias_bytes = (h_p + depth * h_p + dout_p) * 4
    io_bytes = 2 * tm * (din_p * mxu_bytes + dout_p * out_bytes)
    footprint = w_bytes + bias_bytes + io_bytes
    vmem_limit_bytes = int(min(max(2 * footprint, 32 << 20), 48 << 20))
    # TODO(synk): once depth*h_p^2 weights stop fitting comfortably (~>24 MiB),
    # stream hidden-block weights over a layer grid axis / pltpu.emit_pipeline
    # instead of keeping them all VMEM-resident (matters first on v7x).

    out_p = pl.pallas_call(
        functools.partial(_mlp_kernel, depth=depth,
                          unroll=depth <= unroll_max_depth),
        out_shape=jax.ShapeDtypeStruct((b_p, dout_p), out_dtype),
        grid_spec=pltpu.PrefetchScalarGridSpec(
            num_scalar_prefetch=0,
            grid=grid,
            in_specs=in_specs,
            out_specs=pl.BlockSpec((tm, dout_p), lambda i: (i, 0)),
        ),
        compiler_params=pltpu.CompilerParams(
            dimension_semantics=("parallel",),
            vmem_limit_bytes=vmem_limit_bytes,
        ),
    )(*args)

    return out_p[:batch, :output_dim]


def init_mlp_params(key, input_dim, output_dim, hidden_dim, depth,
                    dtype=jnp.float32):
    """Deterministic parameter init (uniform, a la PyTorch Linear default)."""

    def make_linear(k, din, dout):
        kw, kb = jax.random.split(k)
        bound = 1.0 / (din ** 0.5)
        w = jax.random.uniform(kw, (din, dout), dtype, -bound, bound)
        b = jax.random.uniform(kb, (dout,), dtype, -bound, bound)
        return w, b

    keys = jax.random.split(key, depth + 2)
    return {
        "input": make_linear(keys[0], input_dim, hidden_dim),
        "blocks": [make_linear(keys[1 + i], hidden_dim, hidden_dim)
                   for i in range(depth)],
        "output": make_linear(keys[depth + 1], hidden_dim, output_dim),
    }


def mlp_reference(params, x):
    """Plain-JAX f32 reference for correctness checking."""
    w, b = params["input"]
    x = jnp.tanh(x @ w + b)
    for w, b in params["blocks"]:
        x = jnp.tanh(x @ w + b)
    w, b = params["output"]
    return x @ w + b


if __name__ == "__main__":
    key = jax.random.PRNGKey(0)
    k_params, k_x = jax.random.split(key)

    batch, input_dim, hidden_dim, output_dim, depth = 8, 16, 32, 8, 2

    params = init_mlp_params(k_params, input_dim, output_dim, hidden_dim, depth)
    x = jax.random.normal(k_x, (batch, input_dim), jnp.float32)

    fwd = jax.jit(mlp_forward)
    out = jax.block_until_ready(fwd(params, x))

    ref = mlp_reference(params, x)
    assert out.shape == (batch, output_dim)
    # bf16 MXU inputs -> relaxed tolerance vs. the pure-f32 reference.
    assert jnp.allclose(out, ref, atol=3e-2, rtol=3e-2), float(
        jnp.max(jnp.abs(out - ref)))

    print("KERNEL_OK")
</pallas_src>

<mosaic_0001>
module attributes {stable_mosaic.version = 11 : i64} {
  func.func @_mlp_kernel(%arg0: i32, %arg1: memref<8x128xbf16, #tpu.memory_space<vmem>>, %arg2: memref<128x128xbf16, #tpu.memory_space<vmem>>, %arg3: memref<1x128xf32, #tpu.memory_space<vmem>>, %arg4: memref<2x128x128xbf16, #tpu.memory_space<vmem>>, %arg5: memref<2x1x128xf32, #tpu.memory_space<vmem>>, %arg6: memref<128x128xbf16, #tpu.memory_space<vmem>>, %arg7: memref<1x128xf32, #tpu.memory_space<vmem>>, %arg8: memref<8x128xf32, #tpu.memory_space<vmem>>) attributes {dimension_semantics = [#tpu.dimension_semantics<parallel>], iteration_bounds = array<i64: 1>, scalar_prefetch = 0 : i64, scratch_operands = 0 : i64, tpu.core_type = #tpu.core_type<tc>, window_params = [{transform_indices = @transform_0, window_bounds = array<i64: 8, 128>}, {pipeline_mode = #tpu.pipeline_mode<synchronous>, transform_indices = @transform_1, window_bounds = array<i64: 128, 128>}, {pipeline_mode = #tpu.pipeline_mode<synchronous>, transform_indices = @transform_2, window_bounds = array<i64: 1, 128>}, {pipeline_mode = #tpu.pipeline_mode<synchronous>, transform_indices = @transform_3, window_bounds = array<i64: 2, 128, 128>}, {pipeline_mode = #tpu.pipeline_mode<synchronous>, transform_indices = @transform_4, window_bounds = array<i64: 2, 1, 128>}, {pipeline_mode = #tpu.pipeline_mode<synchronous>, transform_indices = @transform_5, window_bounds = array<i64: 128, 128>}, {pipeline_mode = #tpu.pipeline_mode<synchronous>, transform_indices = @transform_6, window_bounds = array<i64: 1, 128>}, {transform_indices = @transform_7, window_bounds = array<i64: 8, 128>}]} {
    %c0 = arith.constant 0 : index
    %c0_0 = arith.constant 0 : index
    %0 = vector.load %arg1[%c0, %c0_0] : memref<8x128xbf16, #tpu.memory_space<vmem>>, vector<8x128xbf16>
    %c0_1 = arith.constant 0 : index
    %c0_2 = arith.constant 0 : index
    %1 = vector.load %arg2[%c0_1, %c0_2] : memref<128x128xbf16, #tpu.memory_space<vmem>>, vector<128x128xbf16>
    %cst = arith.constant dense<0.000000e+00> : vector<8x128xf32>
    %2 = tpu.matmul %0, %1, %cst {dimension_numbers = #tpu.dot_dimension_numbers<[1], [0], [0], [1], [0, 0, 1, 1], [], []>} : vector<8x128xbf16>, vector<128x128xbf16>, vector<8x128xf32> -> vector<8x128xf32>
    %c0_3 = arith.constant 0 : index
    %c0_4 = arith.constant 0 : index
    %3 = vector.load %arg3[%c0_3, %c0_4] : memref<1x128xf32, #tpu.memory_space<vmem>>, vector<1x128xf32>
    %4 = vector.broadcast %3 : vector<1x128xf32> to vector<8x128xf32>
    %5 = arith.addf %2, %4 : vector<8x128xf32>
    %6 = math.tanh %5 : vector<8x128xf32>
    %7 = arith.truncf %6 : vector<8x128xf32> to vector<8x128xbf16>
    %c0_5 = arith.constant 0 : index
    %c0_6 = arith.constant 0 : index
    %c0_7 = arith.constant 0 : index
    %8 = vector.load %arg4[%c0_5, %c0_6, %c0_7] : memref<2x128x128xbf16, #tpu.memory_space<vmem>>, vector<1x128x128xbf16>
    %9 = vector.shape_cast %8 : vector<1x128x128xbf16> to vector<128x128xbf16>
    %cst_8 = arith.constant dense<0.000000e+00> : vector<8x128xf32>
    %10 = tpu.matmul %7, %9, %cst_8 {dimension_numbers = #tpu.dot_dimension_numbers<[1], [0], [0], [1], [0, 0, 1, 1], [], []>} : vector<8x128xbf16>, vector<128x128xbf16>, vector<8x128xf32> -> vector<8x128xf32>
    %c0_9 = arith.constant 0 : index
    %c0_10 = arith.constant 0 : index
    %c0_11 = arith.constant 0 : index
    %11 = vector.load %arg5[%c0_9, %c0_10, %c0_11] : memref<2x1x128xf32, #tpu.memory_space<vmem>>, vector<1x1x128xf32>
    %12 = vector.shape_cast %11 : vector<1x1x128xf32> to vector<1x128xf32>
    %13 = vector.broadcast %12 : vector<1x128xf32> to vector<8x128xf32>
    %14 = arith.addf %10, %13 : vector<8x128xf32>
    %15 = math.tanh %14 : vector<8x128xf32>
    %16 = arith.truncf %15 : vector<8x128xf32> to vector<8x128xbf16>
    %c1 = arith.constant 1 : index
    %c0_12 = arith.constant 0 : index
    %c0_13 = arith.constant 0 : index
    %17 = vector.load %arg4[%c1, %c0_12, %c0_13] : memref<2x128x128xbf16, #tpu.memory_space<vmem>>, vector<1x128x128xbf16>
    %18 = vector.shape_cast %17 : vector<1x128x128xbf16> to vector<128x128xbf16>
    %cst_14 = arith.constant dense<0.000000e+00> : vector<8x128xf32>
    %19 = tpu.matmul %16, %18, %cst_14 {dimension_numbers = #tpu.dot_dimension_numbers<[1], [0], [0], [1], [0, 0, 1, 1], [], []>} : vector<8x128xbf16>, vector<128x128xbf16>, vector<8x128xf32> -> vector<8x128xf32>
    %c1_15 = arith.constant 1 : index
    %c0_16 = arith.constant 0 : index
    %c0_17 = arith.constant 0 : index
    %20 = vector.load %arg5[%c1_15, %c0_16, %c0_17] : memref<2x1x128xf32, #tpu.memory_space<vmem>>, vector<1x1x128xf32>
    %21 = vector.shape_cast %20 : vector<1x1x128xf32> to vector<1x128xf32>
    %22 = vector.broadcast %21 : vector<1x128xf32> to vector<8x128xf32>
    %23 = arith.addf %19, %22 : vector<8x128xf32>
    %24 = math.tanh %23 : vector<8x128xf32>
    %25 = arith.truncf %24 : vector<8x128xf32> to vector<8x128xbf16>
    %c0_18 = arith.constant 0 : index
    %c0_19 = arith.constant 0 : index
    %26 = vector.load %arg6[%c0_18, %c0_19] : memref<128x128xbf16, #tpu.memory_space<vmem>>, vector<128x128xbf16>
    %cst_20 = arith.constant dense<0.000000e+00> : vector<8x128xf32>
    %27 = tpu.matmul %25, %26, %cst_20 {dimension_numbers = #tpu.dot_dimension_numbers<[1], [0], [0], [1], [0, 0, 1, 1], [], []>} : vector<8x128xbf16>, vector<128x128xbf16>, vector<8x128xf32> -> vector<8x128xf32>
    %c0_21 = arith.constant 0 : index
    %c0_22 = arith.constant 0 : index
    %28 = vector.load %arg7[%c0_21, %c0_22] : memref<1x128xf32, #tpu.memory_space<vmem>>, vector<1x128xf32>
    %29 = vector.broadcast %28 : vector<1x128xf32> to vector<8x128xf32>
    %30 = arith.addf %27, %29 : vector<8x128xf32>
    %c0_23 = arith.constant 0 : index
    %c0_24 = arith.constant 0 : index
    %31 = vector.load %arg8[%c0_23, %c0_24] : memref<8x128xf32, #tpu.memory_space<vmem>>, vector<8x128xf32>
    tpu.vector_store %arg8[%c0_23, %c0_24], %30 {strides = array<i32>} : memref<8x128xf32, #tpu.memory_space<vmem>>, vector<8x128xf32>,
    return
  }
  func.func @transform_0(%arg0: i32) -> (i32, i32) {
    %c0_i32 = arith.constant 0 : i32
    %c0_i32_0 = arith.constant 0 : i32
    return %arg0, %c0_i32 : i32, i32
  }
  func.func @transform_1(%arg0: i32) -> (i32, i32) {
    %c0_i32 = arith.constant 0 : i32
    %c0_i32_0 = arith.constant 0 : i32
    %c0_i32_1 = arith.constant 0 : i32
    return %c0_i32, %c0_i32_0 : i32, i32
  }
  func.func @transform_2(%arg0: i32) -> (i32, i32) {
    %c0_i32 = arith.constant 0 : i32
    %c0_i32_0 = arith.constant 0 : i32
    %c0_i32_1 = arith.constant 0 : i32
    return %c0_i32, %c0_i32_0 : i32, i32
  }
  func.func @transform_3(%arg0: i32) -> (i32, i32, i32) {
    %c0_i32 = arith.constant 0 : i32
    %c0_i32_0 = arith.constant 0 : i32
    %c0_i32_1 = arith.constant 0 : i32
    %c0_i32_2 = arith.constant 0 : i32
    return %c0_i32, %c0_i32_0, %c0_i32_1 : i32, i32, i32
  }
  func.func @transform_4(%arg0: i32) -> (i32, i32, i32) {
    %c0_i32 = arith.constant 0 : i32
    %c0_i32_0 = arith.constant 0 : i32
    %c0_i32_1 = arith.constant 0 : i32
    %c0_i32_2 = arith.constant 0 : i32
    return %c0_i32, %c0_i32_0, %c0_i32_1 : i32, i32, i32
  }
  func.func @transform_5(%arg0: i32) -> (i32, i32) {
    %c0_i32 = arith.constant 0 : i32
    %c0_i32_0 = arith.constant 0 : i32
    %c0_i32_1 = arith.constant 0 : i32
    return %c0_i32, %c0_i32_0 : i32, i32
  }
  func.func @transform_6(%arg0: i32) -> (i32, i32) {
    %c0_i32 = arith.constant 0 : i32
    %c0_i32_0 = arith.constant 0 : i32
    %c0_i32_1 = arith.constant 0 : i32
    return %c0_i32, %c0_i32_0 : i32, i32
  }
  func.func @transform_7(%arg0: i32) -> (i32, i32) {
    %c0_i32 = arith.constant 0 : i32
    %c0_i32_0 = arith.constant 0 : i32
    return %arg0, %c0_i32 : i32, i32
  }
}

</mosaic_0001>

<bundles_post_ra>
// kernel: mlp_forward.1
= control target key start
LH: loop header
LB: loop body
LE: loop exit
PB: predicated region body
PF: predicated region fallthrough
CT: control target
= control target key end

     0   :  { %v730_v1 = vmov 0.0   ;;  %vm731_vm0 = vmmov 0   ;;  %s936_s0 = inlined_call_operand.vmem [shape: bf16[8,128], index: 0, kind: input, shape index: {}]   ;;  %s937_s1 = inlined_call_operand.vmem [shape: bf16[128,128], index: 1, kind: input, shape index: {}]   ;;  %s938_s2 = inlined_call_operand.vmem [shape: f32[1,128], index: 2, kind: input, shape index: {}]   ;;  %s939_s3 = inlined_call_operand.vmem [shape: bf16[2,128,128], index: 3, kind: input, shape index: {}]   ;;  %s940_s4 = inlined_call_operand.vmem [shape: f32[2,1,128], index: 4, kind: input, shape index: {}]   ;;  %s941_s5 = inlined_call_operand.vmem [shape: bf16[128,128], index: 5, kind: input, shape index: {}]   ;;  %s942_s6 = inlined_call_operand.vmem [shape: f32[1,128], index: 6, kind: input, shape index: {}]   ;;  %s943_s7 = inlined_call_operand.hbm [shape: f32[8,128], index: 7, kind: output, shape index: {}]  }
   0x1   :  { %v668_v0 = vld [vmem:[%s937_s1] sm:$0xff]   ;;  %585 = vmatprep.subr.bf16.mxu0 %v730_v1  ;;  %605 = vmatprep.subr.bf16.mxu1 %v730_v1  ;;  %v669_v2 = vld [vmem:[%s937_s1 + $0x8] sm:$0xff]   ;;  %v670_v3 = vld [vmem:[%s937_s1 + $0x10] sm:$0xff]  }
   0x2   :  { %586 = vmatpush3.bf16.msra.mxu0 %v668_v0  ;;  %601 = vmatprep.mubr.msk.bf16.mxu0 %vm731_vm0, %v730_v1  ;;  %v676_v4 = vld [vmem:[%s939_s3] sm:$0xff]   ;;  %v671_v5 = vld [vmem:[%s937_s1 + $0x18] sm:$0xff]   ;;  %v677_v6 = vld [vmem:[%s939_s3 + $0x8] sm:$0xff]  }
   0x3   :  { %587 = vmatprep.subr.bf16.mxu0 %v730_v1  ;;  %621 = vmatprep.mubr.msk.bf16.mxu1 %vm731_vm0, %v730_v1  ;;  %v672_v7 = vld [vmem:[%s937_s1 + $0x20] sm:$0xff]   ;;  %v678_v8 = vld [vmem:[%s939_s3 + $0x10] sm:$0xff]   ;;  %v673_v9 = vld [vmem:[%s937_s1 + $0x28] sm:$0xff]  }
   0x4   :  { %606 = vmatpush3.bf16.msra.mxu1 %v676_v4  ;;  %v679_v10 = vld [vmem:[%s939_s3 + $0x18] sm:$0xff]   ;;  %v674_v11 = vld [vmem:[%s937_s1 + $0x30] sm:$0xff]  }
   0x5   :  { %607 = vmatprep.subr.bf16.mxu1 %v730_v1  ;;  %v675_v12 = vld [vmem:[%s937_s1 + $0x38] sm:$0xff]  }
   0x6   :  { %588 = vmatpush3.bf16.msra.mxu0 %v669_v2 }
   0x7   :  { %589 = vmatprep.subr.bf16.mxu0 %v730_v1 }
   0x8   :  { %608 = vmatpush3.bf16.msra.mxu1 %v677_v6 }
   0x9   :  { %609 = vmatprep.subr.bf16.mxu1 %v730_v1 }
   0xa   :  { %590 = vmatpush3.bf16.msra.mxu0 %v670_v3 }
   0xb   :  { %591 = vmatprep.subr.bf16.mxu0 %v730_v1 }
   0xc   :  { %610 = vmatpush3.bf16.msra.mxu1 %v678_v8 }
   0xd   :  { %611 = vmatprep.subr.bf16.mxu1 %v730_v1 }
   0xe   :  { %592 = vmatpush3.bf16.msra.mxu0 %v671_v5 }
   0xf   :  { %593 = vmatprep.subr.bf16.mxu0 %v730_v1 }
  0x10   :  { %612 = vmatpush3.bf16.msra.mxu1 %v679_v10 }
  0x11   :  { %613 = vmatprep.subr.bf16.mxu1 %v730_v1 }
  0x12   :  { %594 = vmatpush3.bf16.msra.mxu0 %v672_v7 }
  0x13   :  { %595 = vmatprep.subr.bf16.mxu0 %v730_v1 }
  0x16   :  { %596 = vmatpush3.bf16.msra.mxu0 %v673_v9 }
  0x17   :  { %597 = vmatprep.subr.bf16.mxu0 %v730_v1 }
  0x1a   :  { %598 = vmatpush3.bf16.msra.mxu0 %v674_v11 }
  0x1b   :  { %12 = vsyncpa [#allocation3], 0  ;;  %599 = vmatprep.subr.bf16.mxu0 %v730_v1  ;;  %v28_v13 = vld [vmem:[%s936_s0] sm:$0xf]  ;;  %v681_v15 = vld [vmem:[%s939_s3 + $0x28] sm:$0xff]   ;;  %s732_s22 = smov [#allocation2]  }
  0x1c   :  { %v680_v14 = vld [vmem:[%s939_s3 + $0x20] sm:$0xff]   ;;  %v682_v16 = vld [vmem:[%s939_s3 + $0x30] sm:$0xff]   ;;  %v683_v17 = vld [vmem:[%s939_s3 + $0x38] sm:$0xff]  }
  0x1d   :  { %614 = vmatpush3.bf16.msra.mxu1 %v680_v14  ;;  %v684_v18 = vld [vmem:[%s939_s3 + $0x40] sm:$0xff]   ;;  %v685_v19 = vld [vmem:[%s939_s3 + $0x48] sm:$0xff]   ;;  %v686_v20 = vld [vmem:[%s939_s3 + $0x50] sm:$0xff]  }
  0x1e   :  { %600 = vmatpush3.bf16.msra.mxu0 %v675_v12  ;;  %615 = vmatprep.subr.bf16.mxu1 %v730_v1  ;;  %v687_v21 = vld [vmem:[%s939_s3 + $0x58] sm:$0xff]   ;;  %v496_v22 = vld [vmem:[%s938_s2] ss:$0 sm:$0xff]  ;;  %v689_v31 = vld [vmem:[%s939_s3 + $0x68] sm:$0xff]  }
  0x1f   :  { %625 = vmatprep.subr.bf16.mxu0 %v730_v1  ;;  %v688_v30 = vld [vmem:[%s939_s3 + $0x60] sm:$0xff]   ;;  %v690_v32 = vld [vmem:[%s939_s3 + $0x70] sm:$0xff]   ;;  %v691_v33 = vld [vmem:[%s939_s3 + $0x78] sm:$0xff]  }
  0x20   :  { %v692_v34 = vld [vmem:[%s941_s5] sm:$0xff]   ;;  %v693_v35 = vld [vmem:[%s941_s5 + $0x8] sm:$0xff]   ;;  %v694_v36 = vld [vmem:[%s941_s5 + $0x10] sm:$0xff]  }
  0x21   :  { %602 = vmatmul.mubr.bf16.vlgmr.msra.gmra.mrb[0].mxu0 %v28_v13  ;;  %616 = vmatpush3.bf16.msra.mxu1 %v681_v15  ;;  %v695_v37 = vld [vmem:[%s941_s5 + $0x18] sm:$0xff]   ;;  %v505_v38 = vld [vmem:[%s940_s4] ss:$0 sm:$0xff]  ;;  %v697_v47 = vld [vmem:[%s941_s5 + $0x28] sm:$0xff]  }
  0x22   :  { %641 = vmatprep.mubr.msk.bf16.mxu0 %vm731_vm0, %v730_v1  ;;  %617 = vmatprep.subr.bf16.mxu1 %v730_v1  ;;  %v696_v46 = vld [vmem:[%s941_s5 + $0x20] sm:$0xff]   ;;  %v698_v48 = vld [vmem:[%s941_s5 + $0x30] sm:$0xff]   ;;  %v699_v49 = vld [vmem:[%s941_s5 + $0x38] sm:$0xff]   ;;  %s488_s5 = sshll.u32 %s732_s22, 4  ;;  %s489_s5 = int_to_ptr.vmem [resolvable:$true] %s488_s5 }
  0x23   :  { %626 = vmatpush3.bf16.msra.mxu0 %v684_v18  ;;  %v531_v50 = vld [vmem:[%s940_s4 + $0x1] ss:$0 sm:$0xff]  ;;  %v540_v58 = vld [vmem:[%s942_s6] ss:$0 sm:$0xff]  ;;  %s706_s4 = scalar_lea.vmem %s489_s5, 128  ;;  %p711_p1 = scmp.lt.s32.totalorder %s489_s5, %s489_s5 }
  0x24   :  { %627 = vmatprep.subr.bf16.mxu0 %v730_v1  ;;  %p707_p0 = scmp.ne.s32.totalorder %s489_s5, %s706_s4  ;;  %p712_p2 = scmp.lt.s32.totalorder %s706_s4, %s706_s4 }
  0x25   :  { %618 = vmatpush3.bf16.msra.mxu1 %v682_v16 }
  0x26   :  { %619 = vmatprep.subr.bf16.mxu1 %v730_v1  ;;  %p713_p3 = por %p712_p2, %p711_p1 }
  0x27   :  { %628 = vmatpush3.bf16.msra.mxu0 %v685_v19 }
  0x28   :  { %629 = vmatprep.subr.bf16.mxu0 %v730_v1  ;;  %p714_p4 = pnand %p713_p3, %p707_p0 }
  0x29   :  { %620 = vmatpush3.bf16.msra.mxu1 %v683_v17 }
  0x2a   :  { %645 = vmatprep.subr.bf16.mxu1 %v730_v1 }
  0x2b   :  { %630 = vmatpush3.bf16.msra.mxu0 %v686_v20 }
  0x2c   :  { %631 = vmatprep.subr.bf16.mxu0 %v730_v1 }
  0x2f   :  { %632 = vmatpush3.bf16.msra.mxu0 %v687_v21 }
  0x30   :  { %633 = vmatprep.subr.bf16.mxu0 %v730_v1 }
  0x33   :  { %634 = vmatpush3.bf16.msra.mxu0 %v688_v30 }
  0x34   :  { %635 = vmatprep.subr.bf16.mxu0 %v730_v1 }
  0x37   :  { %636 = vmatpush3.bf16.msra.mxu0 %v689_v31 }
  0x38   :  { %637 = vmatprep.subr.bf16.mxu0 %v730_v1 }
  0x3b   :  { %638 = vmatpush3.bf16.msra.mxu0 %v690_v32 }
  0x3c   :  { %639 = vmatprep.subr.bf16.mxu0 %v730_v1 }
  0x3f   :  { %640 = vmatpush3.bf16.msra.mxu0 %v691_v33 }
  0xf4   :  { %v134_v23 = vpop.f32.mrb[0].mxu0 }
  0xf5   :  { %v135_v24 = vadd.f32 %v496_v22, %v134_v23  ;;  %v603_v25 = vpop.f32.mrb[1].mxu0 }
  0xf6   :  { %v137_v26 = vpop.f32.mrb[2].mxu0 }
  0xf7   :  { %700 = vtanh.f32 %v135_v24  ;;  %v604_v27 = vpop.f32.mrb[3].mxu0 }
 0x101   :  { %v701_v28 = vpop.eup %700 }
 0x102   :  { %v141_v29 = vpack.c.bf16 %v701_v28, %v701_v28 }
 0x104   :  { %622 = vmatmul.mubr.bf16.vlgmr.msra.gmra.mrb[0].mxu1 %v141_v29 }
 0x105   :  { %661 = vmatprep.mubr.msk.bf16.mxu1 %vm731_vm0, %v730_v1  ;;  %646 = vmatpush3.bf16.msra.mxu1 %v692_v34 }
 0x106   :  { %647 = vmatprep.subr.bf16.mxu1 %v730_v1 }
 0x109   :  { %648 = vmatpush3.bf16.msra.mxu1 %v693_v35 }
 0x10a   :  { %649 = vmatprep.subr.bf16.mxu1 %v730_v1 }
 0x10d   :  { %650 = vmatpush3.bf16.msra.mxu1 %v694_v36 }
 0x10e   :  { %651 = vmatprep.subr.bf16.mxu1 %v730_v1 }
 0x111   :  { %652 = vmatpush3.bf16.msra.mxu1 %v695_v37 }
 0x112   :  { %653 = vmatprep.subr.bf16.mxu1 %v730_v1 }
 0x115   :  { %654 = vmatpush3.bf16.msra.mxu1 %v696_v46 }
 0x116   :  { %655 = vmatprep.subr.bf16.mxu1 %v730_v1 }
 0x119   :  { %656 = vmatpush3.bf16.msra.mxu1 %v697_v47 }
 0x11a   :  { %657 = vmatprep.subr.bf16.mxu1 %v730_v1 }
 0x11d   :  { %658 = vmatpush3.bf16.msra.mxu1 %v698_v48 }
 0x11e   :  { %659 = vmatprep.subr.bf16.mxu1 %v730_v1 }
 0x121   :  { %660 = vmatpush3.bf16.msra.mxu1 %v699_v49 }
 0x1d7   :  { %v247_v39 = vpop.f32.mrb[0].mxu1 }
 0x1d8   :  { %v248_v40 = vadd.f32 %v505_v38, %v247_v39  ;;  %v623_v41 = vpop.f32.mrb[1].mxu1 }
 0x1d9   :  { %v250_v42 = vpop.f32.mrb[2].mxu1 }
 0x1da   :  { %702 = vtanh.f32 %v248_v40  ;;  %v624_v43 = vpop.f32.mrb[3].mxu1 }
 0x1e4   :  { %v703_v44 = vpop.eup %702 }
 0x1e5   :  { %v254_v45 = vpack.c.bf16 %v703_v44, %v703_v44 }
 0x1e7   :  { %642 = vmatmul.mubr.bf16.vlgmr.msra.gmra.mrb[4].mxu0 %v254_v45 }
 0x2ba   :  { %v362_v51 = vpop.f32.mrb[4].mxu0 }
 0x2bb   :  { %v363_v52 = vadd.f32 %v531_v50, %v362_v51  ;;  %v643_v53 = vpop.f32.mrb[5].mxu0 }
 0x2bc   :  { %v365_v54 = vpop.f32.mrb[6].mxu0 }
 0x2bd   :  { %704 = vtanh.f32 %v363_v52  ;;  %v644_v55 = vpop.f32.mrb[7].mxu0 }
 0x2c7   :  { %v705_v56 = vpop.eup %704 }
 0x2c8   :  { %v369_v57 = vpack.c.bf16 %v705_v56, %v705_v56 }
 0x2ca   :  { %662 = vmatmul.mubr.bf16.vlgmr.msra.gmra.mrb[4].mxu1 %v369_v57 }
 0x39d   :  { %v475_v59 = vpop.f32.mrb[4].mxu1 }
 0x39e   :  { %v476_v60 = vadd.f32 %v540_v58, %v475_v59  ;;  %v663_v61 = vpop.f32.mrb[5].mxu1 }
 0x39f   :  { %v478_v62 = vpop.f32.mrb[6].mxu1 }
 0x3a0   :  { %481 = vst [vmem:[#allocation2] sm:$0xff] %v476_v60  ;;  %v664_v63 = vpop.f32.mrb[7].mxu1 }
 0x3a1   :  { %717 = shalt.err (!%p714_p4)
}
 0x3a2   :  { %s718_s6 = scalar_lea.hbm %s943_s7, 128 }
 0x3a3   :  { %p719_p5 = scmp.ne.s32.totalorder %s943_s7, %s718_s6  ;;  %p722_p6 = scmp.lt.u32.totalorder %s718_s6, %s943_s7 }
 0x3a5   :  { %p724_p7 = pnand %p722_p6, %p719_p5 }
 0x3a7   :  { %727 = shalt.err (!%p724_p7)
}
 0x3a8   :  { %491 = dma.vmem_to_hbm [thread:$0]  %s489_s5, 128, %s943_s7, [#allocation3]  }
 0x3a9   :  { %728 = dma.done.wait [#allocation3], 128  }
 0x3aa   :  { %729 = vsyncadd [#allocation3], 4294967168 }
 0x3ab   :  { %495 = vsyncpa [#allocation3], 1 }

</bundles_post_ra>
